<compile_context>
chip_gen: v5e
topology: v5e:2x2
jax: 0.10.0
libtpu: 0.0.40
codegen_flags: <defaults>
</compile_context>

<pallas_src>
import jax
import jax.numpy as jnp
from jax.experimental import pallas as pl
from jax.experimental.pallas import tpu as pltpu

EPS = 1e-5


def _round_up(x, m):
    return (x + m - 1) // m * m


def _conv_stats_kernel(p_ref, w_ref, y_ref, psum_ref, psq_ref):
    """One M-tile: bf16 matmul on the MXU (f32 accumulate) + per-tile
    per-channel sum / sum-of-squares partials for BatchNorm."""
    y = jnp.dot(p_ref[...], w_ref[...], preferred_element_type=jnp.float32)
    y_ref[...] = y
    s = jnp.sum(y, axis=0, keepdims=True)        # (1, Cp) — XLU/VPU filler
    q = jnp.sum(y * y, axis=0, keepdims=True)    # (1, Cp)
    psum_ref[...] = jnp.broadcast_to(s, psum_ref.shape)
    psq_ref[...] = jnp.broadcast_to(q, psq_ref.shape)


def _bn_relu_kernel(y_ref, scale_ref, shift_ref, o_ref):
    """Fused affine BatchNorm + ReLU (VPU), written in place over y."""
    o_ref[...] = jnp.maximum(y_ref[...] * scale_ref[...] + shift_ref[...], 0.0)


def _block_forward_impl(x_nchw, weight, gamma, beta):
    """weight: (C_out, C_in, 4, 4) PyTorch OIHW layout. Returns NCHW float32."""
    N, Cin, H, W = x_nchw.shape
    Cout = weight.shape[0]
    Ho, Wo = H // 2, W // 2
    K = 16 * Cin
    Cp = _round_up(Cout, 128)                    # lane-dense output width

    # ---- glue: NHWC, reflect pad, im2col — built directly in bf16 ----
    x = jnp.transpose(x_nchw, (0, 2, 3, 1)).astype(jnp.bfloat16)
    xp = jnp.pad(x, ((0, 0), (1, 1), (1, 1), (0, 0)), mode="reflect")
    cols = []
    for i in range(4):
        for j in range(4):
            cols.append(xp[:, i:i + 2 * Ho:2, j:j + 2 * Wo:2, :])   # (N,Ho,Wo,Cin)
    patches = jnp.stack(cols, axis=3)                               # (N,Ho,Wo,16,Cin)
    M = N * Ho * Wo
    P = patches.reshape(M, K)

    # Row tiling: large tiles amortize the ~0.35 us/step overhead; pad M so
    # the tiles divide (zero rows are inert for the matmul and the stats).
    tm1 = 512 if M >= 512 else _round_up(M, 16)
    Mp = _round_up(M, tm1)
    if Mp != M:
        P = jnp.pad(P, ((0, Mp - M), (0, 0)))
    tm2 = max([c for c in (2048, 1024, 512, 256, 128, 64, 32, 16, 8)
               if Mp % c == 0] + [tm1])
    nt = Mp // tm1

    # OIHW -> (kh, kw, Cin, Cout) -> (K, Cout) bf16, zero-pad channels to Cp.
    Wm = jnp.transpose(weight, (2, 3, 1, 0)).reshape(K, Cout).astype(jnp.bfloat16)
    Wm = jnp.pad(Wm, ((0, 0), (0, Cp - Cout)))

    # ---- Pallas kernel 1: conv matmul + fused per-tile BN stat partials ----
    vmem1 = int(min(48 * 2**20,
                    max(4 * 2**20,
                        4 * (tm1 * K * 2 + K * Cp * 2 + tm1 * Cp * 4
                             + 2 * 8 * Cp * 4))))
    y, psum, psq = pl.pallas_call(
        _conv_stats_kernel,
        out_shape=(jax.ShapeDtypeStruct((Mp, Cp), jnp.float32),
                   jax.ShapeDtypeStruct((nt, 8, Cp), jnp.float32),
                   jax.ShapeDtypeStruct((nt, 8, Cp), jnp.float32)),
        grid_spec=pltpu.PrefetchScalarGridSpec(
            num_scalar_prefetch=0, grid=(nt,),
            in_specs=[pl.BlockSpec((tm1, K), lambda i: (i, 0)),
                      pl.BlockSpec((K, Cp), lambda i: (0, 0))],
            out_specs=(pl.BlockSpec((tm1, Cp), lambda i: (i, 0)),
                       pl.BlockSpec((None, 8, Cp), lambda i: (i, 0, 0)),
                       pl.BlockSpec((None, 8, Cp), lambda i: (i, 0, 0)))),
        compiler_params=pltpu.CompilerParams(
            dimension_semantics=("parallel",),
            vmem_limit_bytes=vmem1),
    )(P, Wm)

    # ---- tiny JAX glue: finish the reduction, fold BN stats into an affine ----
    csum = jnp.sum(psum[:, 0, :], axis=0)                 # (Cp,)
    csq = jnp.sum(psq[:, 0, :], axis=0)
    mean = csum / M                                       # true M (pad rows are zero)
    var = jnp.maximum(csq / M - mean * mean, 0.0)         # biased var (BN training)
    gamma_p = jnp.pad(gamma.astype(jnp.float32), (0, Cp - Cout))
    beta_p = jnp.pad(beta.astype(jnp.float32), (0, Cp - Cout))
    scale_v = gamma_p / jnp.sqrt(var + EPS)
    shift_v = beta_p - mean * scale_v
    scale = scale_v.reshape(1, Cp)
    shift = shift_v.reshape(1, Cp)

    # ---- Pallas kernel 2: fused BatchNorm + ReLU, in place over y ----
    vmem2 = int(min(48 * 2**20,
                    max(4 * 2**20, 6 * tm2 * Cp * 4 + 4 * Cp * 4)))
    out = pl.pallas_call(
        _bn_relu_kernel,
        out_shape=jax.ShapeDtypeStruct((Mp, Cp), jnp.float32),
        grid_spec=pltpu.PrefetchScalarGridSpec(
            num_scalar_prefetch=0, grid=(Mp // tm2,),
            in_specs=[pl.BlockSpec((tm2, Cp), lambda i: (i, 0)),
                      pl.BlockSpec((1, Cp), lambda i: (0, 0)),
                      pl.BlockSpec((1, Cp), lambda i: (0, 0))],
            out_specs=pl.BlockSpec((tm2, Cp), lambda i: (i, 0))),
        compiler_params=pltpu.CompilerParams(
            dimension_semantics=("parallel",),
            vmem_limit_bytes=vmem2),
        input_output_aliases={0: 0},
    )(y, scale, shift)

    # (Mp, Cp) -> strip padding -> (N, Ho, Wo, Cout) -> NCHW
    out = out[:M, :Cout].reshape(N, Ho, Wo, Cout)
    return jnp.transpose(out, (0, 3, 1, 2))


block_forward = jax.jit(_block_forward_impl)


def _reference_forward(x_nchw, weight, gamma, beta):
    """Pure-JAX f32 reference (reflect-pad conv + train-mode BN + ReLU)."""
    xp = jnp.pad(x_nchw, ((0, 0), (0, 0), (1, 1), (1, 1)), mode="reflect")
    y = jax.lax.conv_general_dilated(
        xp, weight, window_strides=(2, 2), padding="VALID",
        dimension_numbers=("NCHW", "OIHW", "NCHW"))
    mean = jnp.mean(y, axis=(0, 2, 3), keepdims=True)
    var = jnp.var(y, axis=(0, 2, 3), keepdims=True)
    yhat = (y - mean) / jnp.sqrt(var + EPS)
    yhat = yhat * gamma[None, :, None, None] + beta[None, :, None, None]
    return jnp.maximum(yhat, 0.0)


if __name__ == "__main__":
    key = jax.random.PRNGKey(0)
    k_x, k_w = jax.random.split(key)

    N, Cin, Cout, H, W = 2, 4, 8, 16, 16
    x = jax.random.normal(k_x, (N, Cin, H, W), dtype=jnp.float32)
    # Deterministic synthetic params (PyTorch BN default: gamma=1, beta=0)
    weight = 0.1 * jax.random.normal(k_w, (Cout, Cin, 4, 4), dtype=jnp.float32)
    gamma = jnp.ones((Cout,), dtype=jnp.float32)
    beta = jnp.zeros((Cout,), dtype=jnp.float32)

    out = jax.block_until_ready(block_forward(x, weight, gamma, beta))
    ref = jax.block_until_ready(_reference_forward(x, weight, gamma, beta))

    assert out.shape == (N, Cout, H // 2, W // 2), out.shape
    # bf16 matmul operands (f32 accumulation) -> loosened tolerance vs f32 ref.
    max_err = float(jnp.max(jnp.abs(out - ref)))
    assert jnp.allclose(out, ref, atol=5e-2, rtol=5e-2), max_err

    print("KERNEL_OK")
</pallas_src>

<mosaic_0001>
module attributes {stable_mosaic.version = 11 : i64} {
  func.func @_bn_relu_kernel(%arg0: i32, %arg1: memref<128x128xf32, #tpu.memory_space<vmem>>, %arg2: memref<1x128xf32, #tpu.memory_space<vmem>>, %arg3: memref<1x128xf32, #tpu.memory_space<vmem>>, %arg4: memref<128x128xf32, #tpu.memory_space<vmem>>) attributes {dimension_semantics = [#tpu.dimension_semantics<parallel>], iteration_bounds = array<i64: 1>, scalar_prefetch = 0 : i64, scratch_operands = 0 : i64, tpu.core_type = #tpu.core_type<tc>, window_params = [{transform_indices = @transform_0, window_bounds = array<i64: 128, 128>}, {pipeline_mode = #tpu.pipeline_mode<synchronous>, transform_indices = @transform_1, window_bounds = array<i64: 1, 128>}, {pipeline_mode = #tpu.pipeline_mode<synchronous>, transform_indices = @transform_2, window_bounds = array<i64: 1, 128>}, {transform_indices = @transform_3, window_bounds = array<i64: 128, 128>}]} {
    %c0 = arith.constant 0 : index
    %c0_0 = arith.constant 0 : index
    %0 = vector.load %arg1[%c0, %c0_0] : memref<128x128xf32, #tpu.memory_space<vmem>>, vector<128x128xf32>
    %c0_1 = arith.constant 0 : index
    %c0_2 = arith.constant 0 : index
    %1 = vector.load %arg2[%c0_1, %c0_2] : memref<1x128xf32, #tpu.memory_space<vmem>>, vector<1x128xf32>
    %2 = vector.broadcast %1 : vector<1x128xf32> to vector<128x128xf32>
    %3 = arith.mulf %0, %2 : vector<128x128xf32>
    %c0_3 = arith.constant 0 : index
    %c0_4 = arith.constant 0 : index
    %4 = vector.load %arg3[%c0_3, %c0_4] : memref<1x128xf32, #tpu.memory_space<vmem>>, vector<1x128xf32>
    %5 = vector.broadcast %4 : vector<1x128xf32> to vector<128x128xf32>
    %6 = arith.addf %3, %5 : vector<128x128xf32>
    %cst = arith.constant 0.000000e+00 : f32
    %7 = vector.broadcast %cst : f32 to vector<128x128xf32>
    %8 = arith.maximumf %6, %7 : vector<128x128xf32>
    %c0_5 = arith.constant 0 : index
    %c0_6 = arith.constant 0 : index
    %9 = vector.load %arg4[%c0_5, %c0_6] : memref<128x128xf32, #tpu.memory_space<vmem>>, vector<128x128xf32>
    tpu.vector_store %arg4[%c0_5, %c0_6], %8 {strides = array<i32>} : memref<128x128xf32, #tpu.memory_space<vmem>>, vector<128x128xf32>,
    return
  }
  func.func @transform_0(%arg0: i32) -> (i32, i32) {
    %c0_i32 = arith.constant 0 : i32
    %c0_i32_0 = arith.constant 0 : i32
    return %arg0, %c0_i32 : i32, i32
  }
  func.func @transform_1(%arg0: i32) -> (i32, i32) {
    %c0_i32 = arith.constant 0 : i32
    %c0_i32_0 = arith.constant 0 : i32
    %c0_i32_1 = arith.constant 0 : i32
    return %c0_i32, %c0_i32_0 : i32, i32
  }
  func.func @transform_2(%arg0: i32) -> (i32, i32) {
    %c0_i32 = arith.constant 0 : i32
    %c0_i32_0 = arith.constant 0 : i32
    %c0_i32_1 = arith.constant 0 : i32
    return %c0_i32, %c0_i32_0 : i32, i32
  }
  func.func @transform_3(%arg0: i32) -> (i32, i32) {
    %c0_i32 = arith.constant 0 : i32
    %c0_i32_0 = arith.constant 0 : i32
    return %arg0, %c0_i32 : i32, i32
  }
}

module attributes {stable_mosaic.version = 11 : i64} {
  func.func @_conv_stats_kernel(%arg0: i32, %arg1: memref<128x64xbf16, #tpu.memory_space<vmem>>, %arg2: memref<64x128xbf16, #tpu.memory_space<vmem>>, %arg3: memref<128x128xf32, #tpu.memory_space<vmem>>, %arg4: memref<1x8x128xf32, #tpu.memory_space<vmem>>, %arg5: memref<1x8x128xf32, #tpu.memory_space<vmem>>) attributes {dimension_semantics = [#tpu.dimension_semantics<parallel>], iteration_bounds = array<i64: 1>, scalar_prefetch = 0 : i64, scratch_operands = 0 : i64, tpu.core_type = #tpu.core_type<tc>, window_params = [{transform_indices = @transform_0, window_bounds = array<i64: 128, 64>}, {pipeline_mode = #tpu.pipeline_mode<synchronous>, transform_indices = @transform_1, window_bounds = array<i64: 64, 128>}, {transform_indices = @transform_2, window_bounds = array<i64: 128, 128>}, {transform_indices = @transform_3, window_bounds = array<i64: 1, 8, 128>}, {transform_indices = @transform_4, window_bounds = array<i64: 1, 8, 128>}]} {
    %c0 = arith.constant 0 : index
    %c0_0 = arith.constant 0 : index
    %0 = vector.load %arg1[%c0, %c0_0] : memref<128x64xbf16, #tpu.memory_space<vmem>>, vector<128x64xbf16>
    %c0_1 = arith.constant 0 : index
    %c0_2 = arith.constant 0 : index
    %1 = vector.load %arg2[%c0_1, %c0_2] : memref<64x128xbf16, #tpu.memory_space<vmem>>, vector<64x128xbf16>
    %cst = arith.constant dense<0.000000e+00> : vector<128x128xf32>
    %2 = tpu.matmul %0, %1, %cst {dimension_numbers = #tpu.dot_dimension_numbers<[1], [0], [0], [1], [0, 0, 1, 1], [], []>} : vector<128x64xbf16>, vector<64x128xbf16>, vector<128x128xf32> -> vector<128x128xf32>
    %c0_3 = arith.constant 0 : index
    %c0_4 = arith.constant 0 : index
    %3 = vector.load %arg3[%c0_3, %c0_4] : memref<128x128xf32, #tpu.memory_space<vmem>>, vector<128x128xf32>
    tpu.vector_store %arg3[%c0_3, %c0_4], %2 {strides = array<i32>} : memref<128x128xf32, #tpu.memory_space<vmem>>, vector<128x128xf32>,
    %cst_5 = arith.constant dense<0.000000e+00> : vector<128xf32>
    %4 = vector.multi_reduction <add>, %2, %cst_5 [0] : vector<128x128xf32> to vector<128xf32>
    %5 = vector.shape_cast %4 : vector<128xf32> to vector<1x128xf32>
    %6 = arith.mulf %2, %2 : vector<128x128xf32>
    %cst_6 = arith.constant dense<0.000000e+00> : vector<128xf32>
    %7 = vector.multi_reduction <add>, %6, %cst_6 [0] : vector<128x128xf32> to vector<128xf32>
    %8 = vector.shape_cast %7 : vector<128xf32> to vector<1x128xf32>
    %9 = vector.shape_cast %5 : vector<1x128xf32> to vector<1x128xf32>
    %10 = vector.broadcast %9 : vector<1x128xf32> to vector<8x128xf32>
    %c0_7 = arith.constant 0 : index
    %c0_8 = arith.constant 0 : index
    %c0_9 = arith.constant 0 : index
    %11 = vector.load %arg4[%c0_7, %c0_8, %c0_9] : memref<1x8x128xf32, #tpu.memory_space<vmem>>, vector<1x8x128xf32>
    %12 = vector.shape_cast %11 : vector<1x8x128xf32> to vector<8x128xf32>
    %13 = vector.shape_cast %10 : vector<8x128xf32> to vector<1x8x128xf32>
    tpu.vector_store %arg4[%c0_7, %c0_8, %c0_9], %13 {strides = array<i32>} : memref<1x8x128xf32, #tpu.memory_space<vmem>>, vector<1x8x128xf32>,
    %14 = vector.shape_cast %8 : vector<1x128xf32> to vector<1x128xf32>
    %15 = vector.broadcast %14 : vector<1x128xf32> to vector<8x128xf32>
    %c0_10 = arith.constant 0 : index
    %c0_11 = arith.constant 0 : index
    %c0_12 = arith.constant 0 : index
    %16 = vector.load %arg5[%c0_10, %c0_11, %c0_12] : memref<1x8x128xf32, #tpu.memory_space<vmem>>, vector<1x8x128xf32>
    %17 = vector.shape_cast %16 : vector<1x8x128xf32> to vector<8x128xf32>
    %18 = vector.shape_cast %15 : vector<8x128xf32> to vector<1x8x128xf32>
    tpu.vector_store %arg5[%c0_10, %c0_11, %c0_12], %18 {strides = array<i32>} : memref<1x8x128xf32, #tpu.memory_space<vmem>>, vector<1x8x128xf32>,
    return
  }
  func.func @transform_0(%arg0: i32) -> (i32, i32) {
    %c0_i32 = arith.constant 0 : i32
    %c0_i32_0 = arith.constant 0 : i32
    return %arg0, %c0_i32 : i32, i32
  }
  func.func @transform_1(%arg0: i32) -> (i32, i32) {
    %c0_i32 = arith.constant 0 : i32
    %c0_i32_0 = arith.constant 0 : i32
    %c0_i32_1 = arith.constant 0 : i32
    return %c0_i32, %c0_i32_0 : i32, i32
  }
  func.func @transform_2(%arg0: i32) -> (i32, i32) {
    %c0_i32 = arith.constant 0 : i32
    %c0_i32_0 = arith.constant 0 : i32
    return %arg0, %c0_i32 : i32, i32
  }
  func.func @transform_3(%arg0: i32) -> (i32, i32, i32) {
    %c0_i32 = arith.constant 0 : i32
    %c0_i32_0 = arith.constant 0 : i32
    %c0_i32_1 = arith.constant 0 : i32
    return %arg0, %c0_i32, %c0_i32_0 : i32, i32, i32
  }
  func.func @transform_4(%arg0: i32) -> (i32, i32, i32) {
    %c0_i32 = arith.constant 0 : i32
    %c0_i32_0 = arith.constant 0 : i32
    %c0_i32_1 = arith.constant 0 : i32
    return %arg0, %c0_i32, %c0_i32_0 : i32, i32, i32
  }
}

</mosaic_0001>

<bundles_post_ra>
// kernel: _block_forward_impl.3
= control target key start
LH: loop header
LB: loop body
LE: loop exit
PB: predicated region body
PF: predicated region fallthrough
CT: control target
= control target key end

     0   :  { %s248_s0 = inlined_call_operand.vmem [shape: f32[128,128], index: 0, kind: input, shape index: {}, may-alias: {0,3}]   ;;  %s249_s1 = inlined_call_operand.vmem [shape: f32[1,128], index: 1, kind: input, shape index: {}]   ;;  %s250_s2 = inlined_call_operand.vmem [shape: f32[1,128], index: 2, kind: input, shape index: {}]   ;;  %s251_s3 = inlined_call_operand.vmem [shape: f32[128,128], index: 3, kind: output, shape index: {}, may-alias: {0,3}]  }
   0x1   :  { %v14_v0 = vld [vmem:[%s248_s0] sm:$0xff]  ;;  %v15_v3 = vld [vmem:[%s248_s0 + $0x8] sm:$0xff]  ;;  %v16_v6 = vld [vmem:[%s248_s0 + $0x10] sm:$0xff] }
   0x2   :  { %v106_v1 = vld [vmem:[%s249_s1] ss:$0 sm:$0xff]  ;;  %v17_v7 = vld [vmem:[%s248_s0 + $0x18] sm:$0xff]  ;;  %v19_v12 = vld [vmem:[%s248_s0 + $0x28] sm:$0xff] }
   0x3   :  { %v137_v2 = vld [vmem:[%s250_s2] ss:$0 sm:$0xff]  ;;  %v34_v4 = vmul.f32 %v106_v1, %v14_v0  ;;  %v35_v5 = vmul.f32 %v106_v1, %v15_v3  ;;  %v36_v9 = vmul.f32 %v106_v1, %v16_v6  ;;  %v37_v10 = vmul.f32 %v106_v1, %v17_v7  ;;  %v20_v13 = vld [vmem:[%s248_s0 + $0x30] sm:$0xff]  ;;  %v21_v14 = vld [vmem:[%s248_s0 + $0x38] sm:$0xff] }
   0x4   :  { %v18_v8 = vld [vmem:[%s248_s0 + $0x20] sm:$0xff]  ;;  %v39_v17 = vmul.f32 %v106_v1, %v19_v12  ;;  %v40_v18 = vmul.f32 %v106_v1, %v20_v13  ;;  %v41_v22 = vmul.f32 %v106_v1, %v21_v14  ;;  %v23_v24 = vld [vmem:[%s248_s0 + $0x48] sm:$0xff]  ;;  %v24_v29 = vld [vmem:[%s248_s0 + $0x50] sm:$0xff] }
   0x5   :  { %v38_v11 = vmul.f32 %v106_v1, %v18_v8  ;;  %v54_v15 = vadd.f32 %v137_v2, %v34_v4  ;;  %v55_v16 = vadd.f32 %v137_v2, %v35_v5  ;;  %v56_v19 = vadd.f32 %v137_v2, %v36_v9  ;;  %v22_v23 = vld [vmem:[%s248_s0 + $0x40] sm:$0xff]  ;;  %v25_v30 = vld [vmem:[%s248_s0 + $0x58] sm:$0xff]  ;;  %v27_v35 = vld [vmem:[%s248_s0 + $0x68] sm:$0xff] }
   0x6   :  { %v57_v20 = vadd.f32 %v137_v2, %v37_v10  ;;  %v59_v27 = vadd.f32 %v137_v2, %v39_v17  ;;  %v60_v28 = vadd.f32 %v137_v2, %v40_v18  ;;  %v26_v31 = vld [vmem:[%s248_s0 + $0x60] sm:$0xff]  ;;  %v61_v34 = vadd.f32 %v137_v2, %v41_v22  ;;  %v28_v36 = vld [vmem:[%s248_s0 + $0x70] sm:$0xff] }
   0x7   :  { %v58_v21 = vadd.f32 %v137_v2, %v38_v11  ;;  %v70_v25 = vmax.f32 %v54_v15, 0.0  ;;  %v71_v26 = vmax.f32 %v55_v16, 0.0  ;;  %v72_v32 = vmax.f32 %v56_v19, 0.0 }
   0x8   :  { %v73_v33 = vmax.f32 %v57_v20, 0.0  ;;  %v75_v38 = vmax.f32 %v59_v27, 0.0  ;;  %v42_v39 = vmul.f32 %v106_v1, %v22_v23  ;;  %v43_v40 = vmul.f32 %v106_v1, %v23_v24 }
   0x9   :  { %86 = vst [vmem:[%s251_s3] sm:$0xff] %v70_v25  ;;  %v74_v37 = vmax.f32 %v58_v21, 0.0  ;;  %v76_v42 = vmax.f32 %v60_v28, 0.0  ;;  %v44_v43 = vmul.f32 %v106_v1, %v24_v29  ;;  %v45_v44 = vmul.f32 %v106_v1, %v25_v30 }
   0xa   :  { %v46_v45 = vmul.f32 %v106_v1, %v26_v31  ;;  %v62_v46 = vadd.f32 %v137_v2, %v42_v39  ;;  %v63_v47 = vadd.f32 %v137_v2, %v43_v40  ;;  %v47_v48 = vmul.f32 %v106_v1, %v27_v35 }
   0xb   :  { %v48_v49 = vmul.f32 %v106_v1, %v28_v36  ;;  %v77_v50 = vmax.f32 %v61_v34, 0.0  ;;  %v64_v51 = vadd.f32 %v137_v2, %v44_v43  ;;  %v65_v52 = vadd.f32 %v137_v2, %v45_v44 }
   0xc   :  { %v78_v54 = vmax.f32 %v62_v46, 0.0  ;;  %v66_v55 = vadd.f32 %v137_v2, %v46_v45  ;;  %v79_v56 = vmax.f32 %v63_v47, 0.0  ;;  %v67_v57 = vadd.f32 %v137_v2, %v47_v48 }
   0xd   :  { %v80_v58 = vmax.f32 %v64_v51, 0.0  ;;  %v68_v59 = vadd.f32 %v137_v2, %v48_v49  ;;  %v81_v60 = vmax.f32 %v65_v52, 0.0 }
   0xe   :  { %v82_v62 = vmax.f32 %v66_v55, 0.0  ;;  %v83_v63 = vmax.f32 %v67_v57, 0.0 }
   0xf   :  { %v84_v0 = vmax.f32 %v68_v59, 0.0 }
  0x10   :  { %v29_v41 = vld [vmem:[%s248_s0 + $0x78] sm:$0xff] }
  0x11   :  { %87 = vst [vmem:[%s251_s3 + $0x8] sm:$0xff] %v71_v26  ;;  %v49_v53 = vmul.f32 %v106_v1, %v29_v41 }
  0x12   :  { %88 = vst [vmem:[%s251_s3 + $0x10] sm:$0xff] %v72_v32 }
  0x13   :  { %89 = vst [vmem:[%s251_s3 + $0x18] sm:$0xff] %v73_v33  ;;  %v69_v61 = vadd.f32 %v137_v2, %v49_v53 }
  0x14   :  { %90 = vst [vmem:[%s251_s3 + $0x20] sm:$0xff] %v74_v37 }
  0x15   :  { %91 = vst [vmem:[%s251_s3 + $0x28] sm:$0xff] %v75_v38  ;;  %v85_v1 = vmax.f32 %v69_v61, 0.0 }
  0x16   :  { %92 = vst [vmem:[%s251_s3 + $0x30] sm:$0xff] %v76_v42 }
  0x17   :  { %93 = vst [vmem:[%s251_s3 + $0x38] sm:$0xff] %v77_v50 }
  0x18   :  { %94 = vst [vmem:[%s251_s3 + $0x40] sm:$0xff] %v78_v54 }
  0x19   :  { %95 = vst [vmem:[%s251_s3 + $0x48] sm:$0xff] %v79_v56 }
  0x1a   :  { %96 = vst [vmem:[%s251_s3 + $0x50] sm:$0xff] %v80_v58 }
  0x1b   :  { %97 = vst [vmem:[%s251_s3 + $0x58] sm:$0xff] %v81_v60 }
  0x1c   :  { %98 = vst [vmem:[%s251_s3 + $0x60] sm:$0xff] %v82_v62 }
  0x1d   :  { %99 = vst [vmem:[%s251_s3 + $0x68] sm:$0xff] %v83_v63 }
  0x1e   :  { %100 = vst [vmem:[%s251_s3 + $0x70] sm:$0xff] %v84_v0 }
  0x1f   :  { %101 = vst [vmem:[%s251_s3 + $0x78] sm:$0xff] %v85_v1 }

// kernel: _block_forward_impl.2
= control target key start
LH: loop header
LB: loop body
LE: loop exit
PB: predicated region body
PF: predicated region fallthrough
CT: control target
= control target key end

     0   :  { %vm103_vm0 = vcmask 523264   ;;  %s468_s1 = inlined_call_operand.vmem [shape: bf16[64,128], index: 1, kind: input, shape index: {}]   ;;  %s469_s0 = inlined_call_operand.vmem [shape: bf16[128,64], index: 0, kind: input, shape index: {}]   ;;  %s470_s2 = inlined_call_operand.vmem [shape: f32[128,128], index: 2, kind: output, shape index: {0}]   ;;  %s471_s3 = inlined_call_operand.vmem [shape: f32[1,8,128], index: 3, kind: output, shape index: {1}]   ;;  %s472_s4 = inlined_call_operand.vmem [shape: f32[1,8,128], index: 4, kind: output, shape index: {2}]  }
   0x1   :  { %v332_v0 = vld [vmem:[%s468_s1 + $0x18] sm:$0xff]  ;;  %v331_v1 = vld [vmem:[%s468_s1 + $0x10] sm:$0xff]  ;;  %v330_v2 = vld [vmem:[%s468_s1 + $0x8] sm:$0xff] }
   0x2   :  { %132 = vmatpush.bf16.msra.mxu0 %v332_v0  ;;  %333 = vmatpush.bf16.msra.mxu1 %v332_v0  ;;  %v329_v3 = vld [vmem:[%s468_s1] sm:$0xff]  ;;  %v323_v5 = vld [vmem:[%s469_s0 + $0x10] sm:$0xff]  ;;  %v322_v8 = vld [vmem:[%s469_s0 + $0x8] sm:$0xff] }
   0x3   :  { %334 = vmatpush.bf16.msra.mxu2 %v332_v0  ;;  %335 = vmatpush.bf16.msra.mxu3 %v332_v0  ;;  %v321_v4 = vld [vmem:[%s469_s0] sm:$0xff]  ;;  %v327_v7 = vld [vmem:[%s469_s0 + $0x30] sm:$0xff]  ;;  %v324_v9 = vld [vmem:[%s469_s0 + $0x18] sm:$0xff] }
   0x4   :  { %v325_v6 = vld [vmem:[%s469_s0 + $0x20] sm:$0xff]  ;;  %v326_v10 = vld [vmem:[%s469_s0 + $0x28] sm:$0xff]  ;;  %v328_v11 = vld [vmem:[%s469_s0 + $0x38] sm:$0xff] }
   0x6   :  { %133 = vmatpush.bf16.msra.mxu0 %v331_v1  ;;  %336 = vmatpush.bf16.msra.mxu1 %v331_v1 }
   0x7   :  { %337 = vmatpush.bf16.msra.mxu2 %v331_v1  ;;  %338 = vmatpush.bf16.msra.mxu3 %v331_v1 }
   0xa   :  { %134 = vmatpush.bf16.msra.mxu0 %v330_v2  ;;  %339 = vmatpush.bf16.msra.mxu1 %v330_v2 }
   0xb   :  { %340 = vmatpush.bf16.msra.mxu2 %v330_v2  ;;  %341 = vmatpush.bf16.msra.mxu3 %v330_v2 }
   0xe   :  { %135 = vmatpush.bf16.msra.mxu0 %v329_v3  ;;  %342 = vmatpush.bf16.msra.mxu1 %v329_v3 }
   0xf   :  { %343 = vmatpush.bf16.msra.mxu2 %v329_v3  ;;  %344 = vmatpush.bf16.msra.mxu3 %v329_v3 }
  0x11   :  { %313 = vmatmul.msk.bf16.vlgmr.msra.gmra.mxu0 %vm103_vm0, %v321_v4  ;;  %315 = vmatmul.msk.bf16.vlgmr.msra.gmra.mxu1 %vm103_vm0, %v323_v5 }
  0x12   :  { %317 = vmatmul.msk.bf16.vlgmr.msra.gmra.mxu2 %vm103_vm0, %v325_v6  ;;  %319 = vmatmul.msk.bf16.vlgmr.msra.gmra.mxu3 %vm103_vm0, %v327_v7 }
  0x21   :  { %314 = vmatmul.msk.bf16.gmra.mxu0 %vm103_vm0, %v322_v8  ;;  %316 = vmatmul.msk.bf16.gmra.mxu1 %vm103_vm0, %v324_v9 }
  0x22   :  { %318 = vmatmul.msk.bf16.gmra.mxu2 %vm103_vm0, %v326_v10  ;;  %320 = vmatmul.msk.bf16.gmra.mxu3 %vm103_vm0, %v328_v11 }
  0x8e   :  { %v137_v12 = vpop.f32.mrf.mxu0  ;;  %v147_v13 = vpop.f32.mrf.mxu1 }
  0x8f   :  { %177 = vst [vmem:[%s470_s2] sm:$0xff] %v137_v12  ;;  %v214_v23 = vmul.f32 %v137_v12, %v137_v12  ;;  %v218_v35 = vmul.f32 %v147_v13, %v147_v13 }
  0x90   :  { %181 = vst [vmem:[%s470_s2 + $0x20] sm:$0xff] %v147_v13 }
  0x95   :  { %v157_v14 = vpop.f32.mrf.mxu2  ;;  %v167_v15 = vpop.f32.mrf.mxu3 }
  0x96   :  { %v139_v16 = vpop.f32.mrf.mxu0  ;;  %v149_v17 = vpop.f32.mrf.mxu1  ;;  %185 = vst [vmem:[%s470_s2 + $0x40] sm:$0xff] %v157_v14  ;;  %v222_v49 = vmul.f32 %v157_v14, %v157_v14  ;;  %v226_v61 = vmul.f32 %v167_v15, %v167_v15 }
  0x97   :  { %178 = vst [vmem:[%s470_s2 + $0x8] sm:$0xff] %v139_v16  ;;  %v215_v22 = vmul.f32 %v139_v16, %v139_v16  ;;  %v193_v24 = vadd.f32 %v139_v16, %v137_v12  ;;  %v219_v38 = vmul.f32 %v149_v17, %v149_v17 }
  0x98   :  { %182 = vst [vmem:[%s470_s2 + $0x28] sm:$0xff] %v149_v17 }
  0x99   :  { %189 = vst [vmem:[%s470_s2 + $0x60] sm:$0xff] %v167_v15  ;;  %v230_v26 = vadd.f32 %v215_v22, %v214_v23 }
  0x9d   :  { %v159_v18 = vpop.f32.mrf.mxu2  ;;  %v169_v19 = vpop.f32.mrf.mxu3 }
  0x9e   :  { %v142_v20 = vpop.f32.mrf.mxu0  ;;  %v152_v21 = vpop.f32.mrf.mxu1  ;;  %186 = vst [vmem:[%s470_s2 + $0x48] sm:$0xff] %v159_v18  ;;  %v223_v52 = vmul.f32 %v159_v18, %v159_v18  ;;  %v227_v0 = vmul.f32 %v169_v19, %v169_v19 }
  0x9f   :  { %179 = vst [vmem:[%s470_s2 + $0x10] sm:$0xff] %v142_v20  ;;  %v216_v25 = vmul.f32 %v142_v20, %v142_v20  ;;  %v194_v27 = vadd.f32 %v193_v24, %v142_v20  ;;  %v220_v41 = vmul.f32 %v152_v21, %v152_v21 }
  0xa0   :  { %183 = vst [vmem:[%s470_s2 + $0x30] sm:$0xff] %v152_v21 }
  0xa1   :  { %190 = vst [vmem:[%s470_s2 + $0x68] sm:$0xff] %v169_v19  ;;  %v231_v32 = vadd.f32 %v230_v26, %v216_v25 }
  0xa5   :  { %v162_v28 = vpop.f32.mrf.mxu2  ;;  %v172_v29 = vpop.f32.mrf.mxu3 }
  0xa6   :  { %v144_v30 = vpop.f32.mrf.mxu0  ;;  %v154_v31 = vpop.f32.mrf.mxu1  ;;  %187 = vst [vmem:[%s470_s2 + $0x50] sm:$0xff] %v162_v28  ;;  %v224_v56 = vmul.f32 %v162_v28, %v162_v28  ;;  %v228_v4 = vmul.f32 %v172_v29, %v172_v29 }
  0xa7   :  { %180 = vst [vmem:[%s470_s2 + $0x18] sm:$0xff] %v144_v30  ;;  %v195_v33 = vadd.f32 %v194_v27, %v144_v30  ;;  %v217_v34 = vmul.f32 %v144_v30, %v144_v30  ;;  %v221_v47 = vmul.f32 %v154_v31, %v154_v31 }
  0xa8   :  { %184 = vst [vmem:[%s470_s2 + $0x38] sm:$0xff] %v154_v31 }
  0xa9   :  { %v196_v36 = vadd.f32 %v195_v33, %v147_v13  ;;  %v232_v37 = vadd.f32 %v231_v32, %v217_v34  ;;  %191 = vst [vmem:[%s470_s2 + $0x70] sm:$0xff] %v172_v29 }
  0xab   :  { %v233_v39 = vadd.f32 %v232_v37, %v218_v35  ;;  %v197_v40 = vadd.f32 %v196_v36, %v149_v17 }
  0xad   :  { %v198_v42 = vadd.f32 %v197_v40, %v152_v21  ;;  %v234_v43 = vadd.f32 %v233_v39, %v219_v38  ;;  %v164_v44 = vpop.f32.mrf.mxu2  ;;  %v174_v45 = vpop.f32.mrf.mxu3 }
  0xae   :  { %188 = vst [vmem:[%s470_s2 + $0x58] sm:$0xff] %v164_v44  ;;  %v225_v60 = vmul.f32 %v164_v44, %v164_v44  ;;  %v229_v8 = vmul.f32 %v174_v45, %v174_v45 }
  0xaf   :  { %v199_v46 = vadd.f32 %v198_v42, %v154_v31  ;;  %v235_v48 = vadd.f32 %v234_v43, %v220_v41  ;;  %192 = vst [vmem:[%s470_s2 + $0x78] sm:$0xff] %v174_v45 }
  0xb1   :  { %v200_v50 = vadd.f32 %v199_v46, %v157_v14  ;;  %v236_v51 = vadd.f32 %v235_v48, %v221_v47 }
  0xb3   :  { %v237_v53 = vadd.f32 %v236_v51, %v222_v49  ;;  %v201_v54 = vadd.f32 %v200_v50, %v159_v18 }
  0xb5   :  { %v202_v55 = vadd.f32 %v201_v54, %v162_v28  ;;  %v238_v57 = vadd.f32 %v237_v53, %v223_v52 }
  0xb7   :  { %v239_v58 = vadd.f32 %v238_v57, %v224_v56  ;;  %v203_v59 = vadd.f32 %v202_v55, %v164_v44 }
  0xb9   :  { %v204_v62 = vadd.f32 %v203_v59, %v167_v15  ;;  %v240_v63 = vadd.f32 %v239_v58, %v225_v60 }
  0xbb   :  { %v241_v1 = vadd.f32 %v240_v63, %v226_v61  ;;  %v205_v2 = vadd.f32 %v204_v62, %v169_v19 }
  0xbd   :  { %v206_v3 = vadd.f32 %v205_v2, %v172_v29  ;;  %v242_v5 = vadd.f32 %v241_v1, %v227_v0 }
  0xbf   :  { %v243_v6 = vadd.f32 %v242_v5, %v228_v4  ;;  %v207_v7 = vadd.f32 %v206_v3, %v174_v45 }
  0xc1   :  { %v208_v9 = vrot.slane %v207_v7, 4  ;;  %v244_v10 = vadd.f32 %v243_v6, %v229_v8 }
  0xc3   :  { %v209_v11 = vadd.f32 %v208_v9, %v207_v7  ;;  %v245_v12 = vrot.slane %v244_v10, 4 }
  0xc5   :  { %v210_v13 = vrot.slane %v209_v11, 2  ;;  %v246_v14 = vadd.f32 %v245_v12, %v244_v10 }
  0xc7   :  { %v211_v16 = vadd.f32 %v210_v13, %v209_v11  ;;  %v247_v17 = vrot.slane %v246_v14, 2 }
  0xc9   :  { %v212_v18 = vrot.slane %v211_v16, 1  ;;  %v248_v15 = vadd.f32 %v247_v17, %v246_v14 }
  0xcb   :  { %v213_v20 = vadd.f32 %v212_v18, %v211_v16  ;;  %v249_v21 = vrot.slane %v248_v15, 1 }
  0xcd   :  { %v250_v22 = vadd.f32 %v249_v21, %v248_v15  ;;  %251 = vst [vmem:[%s471_s3] sm:$0xff] %v213_v20 }
  0xcf   :  { %252 = vst [vmem:[%s472_s4] sm:$0xff] %v250_v22 }

</bundles_post_ra>
